<compile_context>
chip_gen: v6e
topology: v6e:2x2x1
jax: 0.10.0
libtpu: 0.0.40
codegen_flags: <defaults>
</compile_context>

<pallas_src>
import jax
import jax.numpy as jnp
from jax.experimental import pallas as pl
from jax.experimental.pallas import tpu as pltpu

# ----- "constructor" hyper-parameters (deterministic, in-script) -----
FOCAL_ALPHA = 2          # self.focal_criterion.alpha
FOCAL_BETA = 4           # self.focal_criterion.beta
HM_WEIGHT = 1.0          # self.hm_weight
OFFSET_WEIGHT = 1.0      # self.offset_weight
SIZE_WEIGHT = 0.1        # self.size_weight
EPS = 1e-7

LANES = 128              # lane-dense last dim
MAX_TILE_ROWS = 1024     # 1024*128*4B = 512 KiB per input tile (fits v5e/v7x budgets)
NUM_SHARDS = 2           # leading "parallel" grid axis (2 TCs on v7x; free elsewhere)


def _cdiv(a, b):
    return -(-a // b)


def _round_up(a, b):
    return _cdiv(a, b) * b


def _pow_int(x, p):
    """x**p for a static python int p >= 1 via square-and-multiply (2 muls for p=4)."""
    result = None
    base = x
    while p:
        if p & 1:
            result = base if result is None else result * base
        p >>= 1
        if p:
            base = base * base
    return result


def loss_partial_kernel(phm_ref, poff_ref, psize_ref, ghm_ref, goff_ref, gsize_ref,
                        mask_ref, out_ref, hm_acc, off_acc, size_acc, mask_acc):
    i = pl.program_id(1)

    @pl.when(i == 0)
    def _init():
        hm_acc[...] = jnp.zeros_like(hm_acc)
        off_acc[...] = jnp.zeros_like(off_acc)
        size_acc[...] = jnp.zeros_like(size_acc)
        mask_acc[...] = jnp.zeros_like(mask_acc)

    phm = phm_ref[...]
    ghm = ghm_ref[...]
    mask = mask_ref[...]

    one_m_p = 1.0 - phm
    one_m_g = 1.0 - ghm
    neg_w = _pow_int(one_m_g, FOCAL_BETA)                     # (1 - gt) ** beta
    pos_term = jnp.log(phm + EPS) * _pow_int(one_m_p, FOCAL_ALPHA) * mask
    neg_term = (jnp.log(one_m_p + EPS) * _pow_int(phm, FOCAL_ALPHA)
                * neg_w * (1.0 - mask))
    hm_acc[...] += pos_term + neg_term                        # only the sum is needed

    # |p*m - g*m| == |(p - g) * m| exactly (distributivity); saves one mul/element each.
    off_acc[...] += jnp.abs(poff_ref[...] - goff_ref[...]) * mask
    size_acc[...] += jnp.abs(psize_ref[...] - gsize_ref[...]) * mask
    mask_acc[...] += mask

    @pl.when(i == pl.num_programs(1) - 1)
    def _finalize():
        out_ref[0, 0, :, :] = jnp.broadcast_to(jnp.sum(hm_acc[...]), (8, 128))
        out_ref[0, 1, :, :] = jnp.broadcast_to(jnp.sum(off_acc[...]), (8, 128))
        out_ref[0, 2, :, :] = jnp.broadcast_to(jnp.sum(size_acc[...]), (8, 128))
        out_ref[0, 3, :, :] = jnp.broadcast_to(jnp.sum(mask_acc[...]), (8, 128))


def _flatten_pad(x, padded_rows):
    flat = x.astype(jnp.float32).reshape(-1)
    pad = padded_rows * LANES - flat.shape[0]
    if pad:
        flat = jnp.pad(flat, (0, pad))       # zero padding contributes 0 to every sum
    return flat.reshape(padded_rows, LANES)


def loss_calculator(phm, poff, psize, ghm, goff, gsize, mask):
    """Returns (total_loss, log_dict) — log_dict mirrors LossCalculator.log entries."""
    batch = phm.shape[0]
    total = phm.size
    rows = _cdiv(total, LANES)
    rows_per_shard = _cdiv(rows, NUM_SHARDS)
    tile_rows = min(MAX_TILE_ROWS, _round_up(rows_per_shard, 8))
    num_tiles = _cdiv(rows_per_shard, tile_rows)
    padded_rows = NUM_SHARDS * num_tiles * tile_rows

    inputs = [_flatten_pad(x, padded_rows)
              for x in (phm, poff, psize, ghm, goff, gsize, mask)]

    def idx(c, i):
        return (c * num_tiles + i, 0)

    in_spec = pl.BlockSpec((tile_rows, LANES), idx)

    out = pl.pallas_call(
        loss_partial_kernel,
        out_shape=jax.ShapeDtypeStruct((NUM_SHARDS, 4, 8, 128), jnp.float32),
        grid_spec=pltpu.PrefetchScalarGridSpec(
            num_scalar_prefetch=0,
            grid=(NUM_SHARDS, num_tiles),
            in_specs=[in_spec] * 7,
            out_specs=pl.BlockSpec((1, 4, 8, 128), lambda c, i: (c, 0, 0, 0)),
            scratch_shapes=[pltpu.VMEM((tile_rows, LANES), jnp.float32)] * 4,
        ),
        compiler_params=pltpu.CompilerParams(
            dimension_semantics=("parallel", "arbitrary"),
            vmem_limit_bytes=32 * 1024 * 1024,
        ),
    )(*inputs)

    # Combine per-shard partials; tiny scalar finalize (clip/divide/weight) in JAX.
    partials = out[:, :, 0, 0]                      # (NUM_SHARDS, 4)
    sums = jnp.sum(partials, axis=0)                # (4,)
    hm_sum, off_sum, size_sum, mask_sum = sums[0], sums[1], sums[2], sums[3]

    num_pos = jnp.clip(mask_sum, 1.0, 1e30)         # mask.sum().clamp(1, 1e30)
    hm_loss = -(hm_sum / batch) / num_pos           # FocalLoss
    off_loss = (off_sum / batch) / num_pos          # NormedL1Loss(offset)
    size_loss = (size_sum / batch) / num_pos        # NormedL1Loss(size)
    total_loss = (hm_loss * HM_WEIGHT + off_loss * OFFSET_WEIGHT
                  + size_loss * SIZE_WEIGHT)

    # TODO(synk): the PyTorch module's self.log list-append / .item() host logging has
    # no kernel equivalent; we return the scalars in a dict instead.
    log = {"hm": hm_loss, "offset": off_loss, "size": size_loss, "total": total_loss}
    return total_loss, log


def _reference(phm, poff, psize, ghm, goff, gsize, mask):
    # Pure-JAX re-implementation of the PyTorch forward (correctness check).
    batch = phm.shape[0]
    neg_inds = 1.0 - mask
    neg_weights = (1.0 - ghm) ** FOCAL_BETA
    pos_loss = jnp.log(phm + EPS) * (1.0 - phm) ** FOCAL_ALPHA * mask
    neg_loss = jnp.log(1.0 - phm + EPS) * phm ** FOCAL_ALPHA * neg_weights * neg_inds
    pos_sum = jnp.sum(pos_loss, axis=(1, 2, 3)).mean()
    neg_sum = jnp.sum(neg_loss, axis=(1, 2, 3)).mean()
    num_pos = jnp.clip(jnp.sum(mask), 1.0, 1e30)
    hm_loss = -(pos_sum + neg_sum) / num_pos
    off_loss = jnp.sum(jnp.abs(poff * mask - goff * mask), axis=(1, 2, 3)).mean() / num_pos
    size_loss = jnp.sum(jnp.abs(psize * mask - gsize * mask), axis=(1, 2, 3)).mean() / num_pos
    return hm_loss * HM_WEIGHT + off_loss * OFFSET_WEIGHT + size_loss * SIZE_WEIGHT


if __name__ == "__main__":
    B, C, H, W = 2, 4, 16, 16
    key = jax.random.PRNGKey(0)
    k1, k2, k3, k4, k5, k6, k7 = jax.random.split(key, 7)

    # heatmap predictions in (0, 1); gt heatmap in [0, 1]; mask binary.
    phm = jax.nn.sigmoid(jax.random.normal(k1, (B, C, H, W), jnp.float32))
    ghm = jax.nn.sigmoid(jax.random.normal(k2, (B, C, H, W), jnp.float32))
    mask = (jax.random.uniform(k3, (B, C, H, W)) < 0.2).astype(jnp.float32)
    poff = jax.random.normal(k4, (B, C, H, W), jnp.float32)
    goff = jax.random.normal(k5, (B, C, H, W), jnp.float32)
    psize = jax.random.normal(k6, (B, C, H, W), jnp.float32)
    gsize = jax.random.normal(k7, (B, C, H, W), jnp.float32)

    total, log = loss_calculator(phm, poff, psize, ghm, goff, gsize, mask)
    total = jax.block_until_ready(total)

    ref = _reference(phm, poff, psize, ghm, goff, gsize, mask)
    assert jnp.allclose(total, ref, rtol=1e-5, atol=1e-5), (total, ref)

    print("KERNEL_OK")
</pallas_src>

<mosaic_0001>
module attributes {stable_mosaic.version = 11 : i64} {
  func.func @loss_partial_kernel(%arg0: i32, %arg1: i32, %arg2: memref<8x128xf32, #tpu.memory_space<vmem>>, %arg3: memref<8x128xf32, #tpu.memory_space<vmem>>, %arg4: memref<8x128xf32, #tpu.memory_space<vmem>>, %arg5: memref<8x128xf32, #tpu.memory_space<vmem>>, %arg6: memref<8x128xf32, #tpu.memory_space<vmem>>, %arg7: memref<8x128xf32, #tpu.memory_space<vmem>>, %arg8: memref<8x128xf32, #tpu.memory_space<vmem>>, %arg9: memref<1x4x8x128xf32, #tpu.memory_space<vmem>>, %arg10: memref<8x128xf32, #tpu.memory_space<vmem>>, %arg11: memref<8x128xf32, #tpu.memory_space<vmem>>, %arg12: memref<8x128xf32, #tpu.memory_space<vmem>>, %arg13: memref<8x128xf32, #tpu.memory_space<vmem>>) attributes {dimension_semantics = [#tpu.dimension_semantics<parallel>, #tpu.dimension_semantics<arbitrary>], iteration_bounds = array<i64: 2, 1>, scalar_prefetch = 0 : i64, scratch_operands = 4 : i64, tpu.core_type = #tpu.core_type<tc>, window_params = [{transform_indices = @transform_0, window_bounds = array<i64: 8, 128>}, {transform_indices = @transform_1, window_bounds = array<i64: 8, 128>}, {transform_indices = @transform_2, window_bounds = array<i64: 8, 128>}, {transform_indices = @transform_3, window_bounds = array<i64: 8, 128>}, {transform_indices = @transform_4, window_bounds = array<i64: 8, 128>}, {transform_indices = @transform_5, window_bounds = array<i64: 8, 128>}, {transform_indices = @transform_6, window_bounds = array<i64: 8, 128>}, {transform_indices = @transform_7, window_bounds = array<i64: 1, 4, 8, 128>}]} {
    %c0_i32 = arith.constant 0 : i32
    %0 = arith.cmpi eq, %arg1, %c0_i32 : i32
    %1 = arith.extui %0 : i1 to i32
    %c0_i32_0 = arith.constant 0 : i32
    %2 = arith.cmpi ne, %1, %c0_i32_0 : i32
    scf.if %2 {
      %cst_36 = arith.constant 0.000000e+00 : f32
      %53 = vector.broadcast %cst_36 : f32 to vector<8x128xf32>
      %c0_37 = arith.constant 0 : index
      %c0_38 = arith.constant 0 : index
      %54 = vector.load %arg10[%c0_37, %c0_38] : memref<8x128xf32, #tpu.memory_space<vmem>>, vector<8x128xf32>
      tpu.vector_store %arg10[%c0_37, %c0_38], %53 {strides = array<i32>} : memref<8x128xf32, #tpu.memory_space<vmem>>, vector<8x128xf32>,
      %cst_39 = arith.constant 0.000000e+00 : f32
      %55 = vector.broadcast %cst_39 : f32 to vector<8x128xf32>
      %c0_40 = arith.constant 0 : index
      %c0_41 = arith.constant 0 : index
      %56 = vector.load %arg11[%c0_40, %c0_41] : memref<8x128xf32, #tpu.memory_space<vmem>>, vector<8x128xf32>
      tpu.vector_store %arg11[%c0_40, %c0_41], %55 {strides = array<i32>} : memref<8x128xf32, #tpu.memory_space<vmem>>, vector<8x128xf32>,
      %cst_42 = arith.constant 0.000000e+00 : f32
      %57 = vector.broadcast %cst_42 : f32 to vector<8x128xf32>
      %c0_43 = arith.constant 0 : index
      %c0_44 = arith.constant 0 : index
      %58 = vector.load %arg12[%c0_43, %c0_44] : memref<8x128xf32, #tpu.memory_space<vmem>>, vector<8x128xf32>
      tpu.vector_store %arg12[%c0_43, %c0_44], %57 {strides = array<i32>} : memref<8x128xf32, #tpu.memory_space<vmem>>, vector<8x128xf32>,
      %cst_45 = arith.constant 0.000000e+00 : f32
      %59 = vector.broadcast %cst_45 : f32 to vector<8x128xf32>
      %c0_46 = arith.constant 0 : index
      %c0_47 = arith.constant 0 : index
      %60 = vector.load %arg13[%c0_46, %c0_47] : memref<8x128xf32, #tpu.memory_space<vmem>>, vector<8x128xf32>
      tpu.vector_store %arg13[%c0_46, %c0_47], %59 {strides = array<i32>} : memref<8x128xf32, #tpu.memory_space<vmem>>, vector<8x128xf32>,
    } else {
    }
    %c0 = arith.constant 0 : index
    %c0_1 = arith.constant 0 : index
    %3 = vector.load %arg2[%c0, %c0_1] : memref<8x128xf32, #tpu.memory_space<vmem>>, vector<8x128xf32>
    %c0_2 = arith.constant 0 : index
    %c0_3 = arith.constant 0 : index
    %4 = vector.load %arg5[%c0_2, %c0_3] : memref<8x128xf32, #tpu.memory_space<vmem>>, vector<8x128xf32>
    %c0_4 = arith.constant 0 : index
    %c0_5 = arith.constant 0 : index
    %5 = vector.load %arg8[%c0_4, %c0_5] : memref<8x128xf32, #tpu.memory_space<vmem>>, vector<8x128xf32>
    %cst = arith.constant 1.000000e+00 : f32
    %6 = vector.broadcast %cst : f32 to vector<8x128xf32>
    %7 = arith.subf %6, %3 : vector<8x128xf32>
    %cst_6 = arith.constant 1.000000e+00 : f32
    %8 = vector.broadcast %cst_6 : f32 to vector<8x128xf32>
    %9 = arith.subf %8, %4 : vector<8x128xf32>
    %10 = arith.mulf %9, %9 : vector<8x128xf32>
    %11 = arith.mulf %10, %10 : vector<8x128xf32>
    %cst_7 = arith.constant 1.000000e-07 : f32
    %12 = vector.broadcast %cst_7 : f32 to vector<8x128xf32>
    %13 = arith.addf %3, %12 : vector<8x128xf32>
    %14 = math.log %13 : vector<8x128xf32>
    %15 = arith.mulf %7, %7 : vector<8x128xf32>
    %16 = arith.mulf %14, %15 : vector<8x128xf32>
    %17 = arith.mulf %16, %5 : vector<8x128xf32>
    %cst_8 = arith.constant 1.000000e-07 : f32
    %18 = vector.broadcast %cst_8 : f32 to vector<8x128xf32>
    %19 = arith.addf %7, %18 : vector<8x128xf32>
    %20 = math.log %19 : vector<8x128xf32>
    %21 = arith.mulf %3, %3 : vector<8x128xf32>
    %22 = arith.mulf %20, %21 : vector<8x128xf32>
    %23 = arith.mulf %22, %11 : vector<8x128xf32>
    %cst_9 = arith.constant 1.000000e+00 : f32
    %24 = vector.broadcast %cst_9 : f32 to vector<8x128xf32>
    %25 = arith.subf %24, %5 : vector<8x128xf32>
    %26 = arith.mulf %23, %25 : vector<8x128xf32>
    %c0_10 = arith.constant 0 : index
    %c0_11 = arith.constant 0 : index
    %27 = vector.load %arg10[%c0_10, %c0_11] : memref<8x128xf32, #tpu.memory_space<vmem>>, vector<8x128xf32>
    %28 = arith.addf %17, %26 : vector<8x128xf32>
    %29 = arith.addf %27, %28 : vector<8x128xf32>
    %c0_12 = arith.constant 0 : index
    %c0_13 = arith.constant 0 : index
    %30 = vector.load %arg10[%c0_12, %c0_13] : memref<8x128xf32, #tpu.memory_space<vmem>>, vector<8x128xf32>
    tpu.vector_store %arg10[%c0_12, %c0_13], %29 {strides = array<i32>} : memref<8x128xf32, #tpu.memory_space<vmem>>, vector<8x128xf32>,
    %c0_14 = arith.constant 0 : index
    %c0_15 = arith.constant 0 : index
    %31 = vector.load %arg11[%c0_14, %c0_15] : memref<8x128xf32, #tpu.memory_space<vmem>>, vector<8x128xf32>
    %c0_16 = arith.constant 0 : index
    %c0_17 = arith.constant 0 : index
    %32 = vector.load %arg3[%c0_16, %c0_17] : memref<8x128xf32, #tpu.memory_space<vmem>>, vector<8x128xf32>
    %c0_18 = arith.constant 0 : index
    %c0_19 = arith.constant 0 : index
    %33 = vector.load %arg6[%c0_18, %c0_19] : memref<8x128xf32, #tpu.memory_space<vmem>>, vector<8x128xf32>
    %34 = arith.subf %32, %33 : vector<8x128xf32>
    %35 = math.absf %34 : vector<8x128xf32>
    %36 = arith.mulf %35, %5 : vector<8x128xf32>
    %37 = arith.addf %31, %36 : vector<8x128xf32>
    %c0_20 = arith.constant 0 : index
    %c0_21 = arith.constant 0 : index
    %38 = vector.load %arg11[%c0_20, %c0_21] : memref<8x128xf32, #tpu.memory_space<vmem>>, vector<8x128xf32>
    tpu.vector_store %arg11[%c0_20, %c0_21], %37 {strides = array<i32>} : memref<8x128xf32, #tpu.memory_space<vmem>>, vector<8x128xf32>,
    %c0_22 = arith.constant 0 : index
    %c0_23 = arith.constant 0 : index
    %39 = vector.load %arg12[%c0_22, %c0_23] : memref<8x128xf32, #tpu.memory_space<vmem>>, vector<8x128xf32>
    %c0_24 = arith.constant 0 : index
    %c0_25 = arith.constant 0 : index
    %40 = vector.load %arg4[%c0_24, %c0_25] : memref<8x128xf32, #tpu.memory_space<vmem>>, vector<8x128xf32>
    %c0_26 = arith.constant 0 : index
    %c0_27 = arith.constant 0 : index
    %41 = vector.load %arg7[%c0_26, %c0_27] : memref<8x128xf32, #tpu.memory_space<vmem>>, vector<8x128xf32>
    %42 = arith.subf %40, %41 : vector<8x128xf32>
    %43 = math.absf %42 : vector<8x128xf32>
    %44 = arith.mulf %43, %5 : vector<8x128xf32>
    %45 = arith.addf %39, %44 : vector<8x128xf32>
    %c0_28 = arith.constant 0 : index
    %c0_29 = arith.constant 0 : index
    %46 = vector.load %arg12[%c0_28, %c0_29] : memref<8x128xf32, #tpu.memory_space<vmem>>, vector<8x128xf32>
    tpu.vector_store %arg12[%c0_28, %c0_29], %45 {strides = array<i32>} : memref<8x128xf32, #tpu.memory_space<vmem>>, vector<8x128xf32>,
    %c0_30 = arith.constant 0 : index
    %c0_31 = arith.constant 0 : index
    %47 = vector.load %arg13[%c0_30, %c0_31] : memref<8x128xf32, #tpu.memory_space<vmem>>, vector<8x128xf32>
    %48 = arith.addf %47, %5 : vector<8x128xf32>
    %c0_32 = arith.constant 0 : index
    %c0_33 = arith.constant 0 : index
    %49 = vector.load %arg13[%c0_32, %c0_33] : memref<8x128xf32, #tpu.memory_space<vmem>>, vector<8x128xf32>
    tpu.vector_store %arg13[%c0_32, %c0_33], %48 {strides = array<i32>} : memref<8x128xf32, #tpu.memory_space<vmem>>, vector<8x128xf32>,
    %c0_i32_34 = arith.constant 0 : i32
    %50 = arith.cmpi eq, %arg1, %c0_i32_34 : i32
    %51 = arith.extui %50 : i1 to i32
    %c0_i32_35 = arith.constant 0 : i32
    %52 = arith.cmpi ne, %51, %c0_i32_35 : i32
    scf.if %52 {
      %c0_36 = arith.constant 0 : index
      %c0_37 = arith.constant 0 : index
      %53 = vector.load %arg10[%c0_36, %c0_37] : memref<8x128xf32, #tpu.memory_space<vmem>>, vector<8x128xf32>
      %54 = vector.shape_cast %53 : vector<8x128xf32> to vector<1x8x128xf32>
      %cst_38 = arith.constant dense<0.000000e+00> : vector<1xf32>
      %55 = vector.multi_reduction <add>, %54, %cst_38 [1, 2] : vector<1x8x128xf32> to vector<1xf32>
      %56 = vector.shape_cast %55 : vector<1xf32> to vector<1x1x1xf32>
      %57 = vector.extract %56[0, 0, 0] : f32 from vector<1x1x1xf32>
      %58 = vector.broadcast %57 : f32 to vector<8x128xf32>
      %c0_39 = arith.constant 0 : index
      %c0_40 = arith.constant 0 : index
      %c0_41 = arith.constant 0 : index
      %c0_42 = arith.constant 0 : index
      %59 = vector.load %arg9[%c0_39, %c0_40, %c0_41, %c0_42] : memref<1x4x8x128xf32, #tpu.memory_space<vmem>>, vector<1x1x8x128xf32>
      %60 = vector.shape_cast %59 : vector<1x1x8x128xf32> to vector<8x128xf32>
      %61 = vector.shape_cast %58 : vector<8x128xf32> to vector<1x1x8x128xf32>
      tpu.vector_store %arg9[%c0_39, %c0_40, %c0_41, %c0_42], %61 {strides = array<i32>} : memref<1x4x8x128xf32, #tpu.memory_space<vmem>>, vector<1x1x8x128xf32>,
      %c0_43 = arith.constant 0 : index
      %c0_44 = arith.constant 0 : index
      %62 = vector.load %arg11[%c0_43, %c0_44] : memref<8x128xf32, #tpu.memory_space<vmem>>, vector<8x128xf32>
      %63 = vector.shape_cast %62 : vector<8x128xf32> to vector<1x8x128xf32>
      %cst_45 = arith.constant dense<0.000000e+00> : vector<1xf32>
      %64 = vector.multi_reduction <add>, %63, %cst_45 [1, 2] : vector<1x8x128xf32> to vector<1xf32>
      %65 = vector.shape_cast %64 : vector<1xf32> to vector<1x1x1xf32>
      %66 = vector.extract %65[0, 0, 0] : f32 from vector<1x1x1xf32>
      %67 = vector.broadcast %66 : f32 to vector<8x128xf32>
      %c0_46 = arith.constant 0 : index
      %c1 = arith.constant 1 : index
      %c0_47 = arith.constant 0 : index
      %c0_48 = arith.constant 0 : index
      %68 = vector.load %arg9[%c0_46, %c1, %c0_47, %c0_48] : memref<1x4x8x128xf32, #tpu.memory_space<vmem>>, vector<1x1x8x128xf32>
      %69 = vector.shape_cast %68 : vector<1x1x8x128xf32> to vector<8x128xf32>
      %70 = vector.shape_cast %67 : vector<8x128xf32> to vector<1x1x8x128xf32>
      tpu.vector_store %arg9[%c0_46, %c1, %c0_47, %c0_48], %70 {strides = array<i32>} : memref<1x4x8x128xf32, #tpu.memory_space<vmem>>, vector<1x1x8x128xf32>,
      %c0_49 = arith.constant 0 : index
      %c0_50 = arith.constant 0 : index
      %71 = vector.load %arg12[%c0_49, %c0_50] : memref<8x128xf32, #tpu.memory_space<vmem>>, vector<8x128xf32>
      %72 = vector.shape_cast %71 : vector<8x128xf32> to vector<1x8x128xf32>
      %cst_51 = arith.constant dense<0.000000e+00> : vector<1xf32>
      %73 = vector.multi_reduction <add>, %72, %cst_51 [1, 2] : vector<1x8x128xf32> to vector<1xf32>
      %74 = vector.shape_cast %73 : vector<1xf32> to vector<1x1x1xf32>
      %75 = vector.extract %74[0, 0, 0] : f32 from vector<1x1x1xf32>
      %76 = vector.broadcast %75 : f32 to vector<8x128xf32>
      %c0_52 = arith.constant 0 : index
      %c2 = arith.constant 2 : index
      %c0_53 = arith.constant 0 : index
      %c0_54 = arith.constant 0 : index
      %77 = vector.load %arg9[%c0_52, %c2, %c0_53, %c0_54] : memref<1x4x8x128xf32, #tpu.memory_space<vmem>>, vector<1x1x8x128xf32>
      %78 = vector.shape_cast %77 : vector<1x1x8x128xf32> to vector<8x128xf32>
      %79 = vector.shape_cast %76 : vector<8x128xf32> to vector<1x1x8x128xf32>
      tpu.vector_store %arg9[%c0_52, %c2, %c0_53, %c0_54], %79 {strides = array<i32>} : memref<1x4x8x128xf32, #tpu.memory_space<vmem>>, vector<1x1x8x128xf32>,
      %c0_55 = arith.constant 0 : index
      %c0_56 = arith.constant 0 : index
      %80 = vector.load %arg13[%c0_55, %c0_56] : memref<8x128xf32, #tpu.memory_space<vmem>>, vector<8x128xf32>
      %81 = vector.shape_cast %80 : vector<8x128xf32> to vector<1x8x128xf32>
      %cst_57 = arith.constant dense<0.000000e+00> : vector<1xf32>
      %82 = vector.multi_reduction <add>, %81, %cst_57 [1, 2] : vector<1x8x128xf32> to vector<1xf32>
      %83 = vector.shape_cast %82 : vector<1xf32> to vector<1x1x1xf32>
      %84 = vector.extract %83[0, 0, 0] : f32 from vector<1x1x1xf32>
      %85 = vector.broadcast %84 : f32 to vector<8x128xf32>
      %c0_58 = arith.constant 0 : index
      %c3 = arith.constant 3 : index
      %c0_59 = arith.constant 0 : index
      %c0_60 = arith.constant 0 : index
      %86 = vector.load %arg9[%c0_58, %c3, %c0_59, %c0_60] : memref<1x4x8x128xf32, #tpu.memory_space<vmem>>, vector<1x1x8x128xf32>
      %87 = vector.shape_cast %86 : vector<1x1x8x128xf32> to vector<8x128xf32>
      %88 = vector.shape_cast %85 : vector<8x128xf32> to vector<1x1x8x128xf32>
      tpu.vector_store %arg9[%c0_58, %c3, %c0_59, %c0_60], %88 {strides = array<i32>} : memref<1x4x8x128xf32, #tpu.memory_space<vmem>>, vector<1x1x8x128xf32>,
    } else {
    }
    return
  }
  func.func @transform_0(%arg0: i32, %arg1: i32) -> (i32, i32) {
    %c1_i32 = arith.constant 1 : i32
    %0 = arith.muli %arg0, %c1_i32 : i32
    %1 = arith.addi %0, %arg1 : i32
    %c0_i32 = arith.constant 0 : i32
    %c0_i32_0 = arith.constant 0 : i32
    return %1, %c0_i32 : i32, i32
  }
  func.func @transform_1(%arg0: i32, %arg1: i32) -> (i32, i32) {
    %c1_i32 = arith.constant 1 : i32
    %0 = arith.muli %arg0, %c1_i32 : i32
    %1 = arith.addi %0, %arg1 : i32
    %c0_i32 = arith.constant 0 : i32
    %c0_i32_0 = arith.constant 0 : i32
    return %1, %c0_i32 : i32, i32
  }
  func.func @transform_2(%arg0: i32, %arg1: i32) -> (i32, i32) {
    %c1_i32 = arith.constant 1 : i32
    %0 = arith.muli %arg0, %c1_i32 : i32
    %1 = arith.addi %0, %arg1 : i32
    %c0_i32 = arith.constant 0 : i32
    %c0_i32_0 = arith.constant 0 : i32
    return %1, %c0_i32 : i32, i32
  }
  func.func @transform_3(%arg0: i32, %arg1: i32) -> (i32, i32) {
    %c1_i32 = arith.constant 1 : i32
    %0 = arith.muli %arg0, %c1_i32 : i32
    %1 = arith.addi %0, %arg1 : i32
    %c0_i32 = arith.constant 0 : i32
    %c0_i32_0 = arith.constant 0 : i32
    return %1, %c0_i32 : i32, i32
  }
  func.func @transform_4(%arg0: i32, %arg1: i32) -> (i32, i32) {
    %c1_i32 = arith.constant 1 : i32
    %0 = arith.muli %arg0, %c1_i32 : i32
    %1 = arith.addi %0, %arg1 : i32
    %c0_i32 = arith.constant 0 : i32
    %c0_i32_0 = arith.constant 0 : i32
    return %1, %c0_i32 : i32, i32
  }
  func.func @transform_5(%arg0: i32, %arg1: i32) -> (i32, i32) {
    %c1_i32 = arith.constant 1 : i32
    %0 = arith.muli %arg0, %c1_i32 : i32
    %1 = arith.addi %0, %arg1 : i32
    %c0_i32 = arith.constant 0 : i32
    %c0_i32_0 = arith.constant 0 : i32
    return %1, %c0_i32 : i32, i32
  }
  func.func @transform_6(%arg0: i32, %arg1: i32) -> (i32, i32) {
    %c1_i32 = arith.constant 1 : i32
    %0 = arith.muli %arg0, %c1_i32 : i32
    %1 = arith.addi %0, %arg1 : i32
    %c0_i32 = arith.constant 0 : i32
    %c0_i32_0 = arith.constant 0 : i32
    return %1, %c0_i32 : i32, i32
  }
  func.func @transform_7(%arg0: i32, %arg1: i32) -> (i32, i32, i32, i32) {
    %c0_i32 = arith.constant 0 : i32
    %c0_i32_0 = arith.constant 0 : i32
    %c0_i32_1 = arith.constant 0 : i32
    %c0_i32_2 = arith.constant 0 : i32
    return %arg0, %c0_i32, %c0_i32_0, %c0_i32_1 : i32, i32, i32, i32
  }
}

</mosaic_0001>

<bundles_post_ra>
// kernel: tpu_custom_call.1
= control target key start
LH: loop header
LB: loop body
LE: loop exit
PB: predicated region body
PF: predicated region fallthrough
CT: control target
= control target key end

     0   :  { %s1652_s0 = inlined_call_operand.hbm [shape: f32[16,128], index: 0, kind: input, shape index: {}]   ;;  %s1653_s1 = inlined_call_operand.hbm [shape: f32[16,128], index: 1, kind: input, shape index: {}]   ;;  %s1654_s2 = inlined_call_operand.hbm [shape: f32[16,128], index: 2, kind: input, shape index: {}]   ;;  %s1655_s3 = inlined_call_operand.hbm [shape: f32[16,128], index: 3, kind: input, shape index: {}]   ;;  %s1656_s4 = inlined_call_operand.hbm [shape: f32[16,128], index: 4, kind: input, shape index: {}]   ;;  %s1657_s5 = inlined_call_operand.hbm [shape: f32[16,128], index: 5, kind: input, shape index: {}]   ;;  %s1658_s6 = inlined_call_operand.hbm [shape: f32[16,128], index: 6, kind: input, shape index: {}]   ;;  %s1659_s7 = inlined_call_operand.hbm [shape: f32[2,4,8,128], index: 7, kind: output, shape index: {}]  }
   0x1   :  { %1670 = sst [smem:[#allocation30_spill]] %s1653_s1 }
   0x2   :  { %1671 = sst [smem:[#allocation31_spill]] %s1655_s3 }
   0x3   :  { %1672 = sst [smem:[#allocation32_spill]] %s1657_s5 }
   0x4   :  { %1673 = sst [smem:[#allocation33_spill]] %s1659_s7 }
   0x5   :  { %12 = vsyncpa [#allocation7], 0 }
   0x6   :  { %14 = vsyncpa [#allocation7 + $0x1], 0 }
   0x7   :  { %15 = vsyncpa [#allocation10], 0 }
   0x8   :  { %17 = vsyncpa [#allocation10 + $0x1], 0 }
   0x9   :  { %18 = vsyncpa [#allocation13], 0 }
   0xa   :  { %20 = vsyncpa [#allocation13 + $0x1], 0 }
   0xb   :  { %21 = vsyncpa [#allocation16], 0 }
   0xc   :  { %23 = vsyncpa [#allocation16 + $0x1], 0 }
   0xd   :  { %24 = vsyncpa [#allocation8], 0 }
   0xe   :  { %26 = vsyncpa [#allocation8 + $0x1], 0  ;;  %s1366_s24 = smov 0   ;;  %s1368_s25 = smov 0  }
   0xf   :  { %s1370_s26 = smov 0   ;;  %s1372_s27 = smov 0  }
  0x10   :  { %s1374_s28 = smov 0   ;;  %s1376_s29 = smov 0  }
  0x11 LB: > { %1674 = sst [smem:[#allocation24_spill]] %s1294_s24  ;;  %s1397_s30 = sadd.s32 4294967295, %s1314_s29   ;;  %s1314_s29 = sphi %s1376_s29, %s32_s29   ;;  %s1310_s28 = sphi %s1374_s28, %s1700_s28   ;;  %s1306_s27 = sphi %s1372_s27, %s1699_s27   ;;  %s1302_s26 = sphi %s1370_s26, %s1703_s26   ;;  %s1298_s25 = sphi %s1368_s25, %s1702_s25   ;;  %s1294_s24 = sphi %s1366_s24, %s1701_s24  }
  0x12   : > { %1675 = sst [smem:[#allocation25_spill]] %s1310_s28  ;;  %s885_s8 = sadd.s32 4294967294, %s1314_s29  }
  0x13   : > { %1676 = sst [smem:[#allocation26_spill]] %s1314_s29  ;;  %s44_s9 = sadd.s32 1, %s1310_s28 }
  0x14   : > { %s53_s10 = sadd.s32 1, %s1302_s26  ;;  %p46_p0 = scmp.ge.s32.totalorder %s44_s9, 2 }
  0x15   : > { %p60_p1 = scmp.ne.s32.totalorder %s1302_s26, %s1298_s25  ;;  %p61_p2 = scmp.eq.s32.totalorder %s1314_s29, 0 }
  0x16   : > { %p66_p3 = scmp.ne.s32.totalorder %s1298_s25, %s1294_s24  ;;  %s1705_s9 = smov (%p46_p0, %s44_s9), 0 }
  0x17   : > { %1677 = sst [smem:[#allocation27_spill]] %s1705_s9  ;;  %p1409_p4 = por %p61_p2, %p60_p1 }
  0x18   : > { %p67_p5 = scmp.eq.s32.totalorder %s1397_s30, 0  ;;  %s50_s12 = ssub.s32 %s1310_s28, %s1705_s9 }
  0x19   : > { %p258_p6 = scmp.eq.s32.totalorder %s1397_s30, 1  ;;  %p51_p7 = scmp.eq.s32.totalorder %s50_s12, 0 }
  0x1a   : > { %p1417_p8 = por %p67_p5, %p66_p3  ;;  %p264_p10 = scmp.eq.s32.totalorder %s885_s8, 1 }
  0x1b   : > { %p1421_p9 = por %p258_p6, %p60_p1  ;;  %p970_p13 = scmp.lt.s32.totalorder %s1314_s29, 2 }
  0x1c   : > { %s1426_s15 = scalar_select %p51_p7, %s1302_s26, %s53_s10  }
  0x1d   : > { %p1428_p11 = por %p264_p10, %p66_p3  ;;  %s1660_s17 = sand.u32 1, %s1302_s26  }
  0x1e   : > { %1681 = sst [smem:[#allocation28_spill]] %s1426_s15  ;;  %s1437_s18 = sshll.u32 %s1660_s17, 3 }
  0x1f   : > { %s1682_s16 = scalar_select %p1428_p11, 1, 0 }
  0x20   : > { %s1440_s19 = sshll.u32 %s1310_s28, 7  ;;  %p1444_p0 = pnand %p970_p13, %p1409_p4 }
  0x21   : > { %1683 = sst [smem:[#allocation29_spill]] %s1682_s16  ;;  %s1449_s21 = sand.u32 1, %s1314_s29  }
  0x22   : > { %s1685_s1 = sld [smem:[#allocation30_spill]]  ;;  %s307_s10 = scalar_lea.vmem [#allocation9], %s1437_s18 }
  0x23   : > { %s315_s12 = sshll.u32 %s307_s10, 4  ;;  %p902_p1 = scmp.ge.s32.totalorder %s1314_s29, 1  ;;  %s316_s12 = int_to_ptr.vmem [resolvable:$true] %s315_s12 }
  0x24   : > { %p415_p2 = scmp.lt.s32.totalorder %s1314_s29, 3  ;;  %s1664_s17 = scalar_lea.sflag [#allocation10], %s1449_s21 }
  0x25   : > { %p1461_p3 = pneg %p1444_p0  ;;  %s1039_s9 = scalar_lea.vmem %s316_s12, 128 }
  0x26   : > { %p1040_p4 = scmp.ne.s32.totalorder %s316_s12, %s1039_s9  ;;  %s1316_s22 = smov [#allocation9]  }
  0x27   : > { %s1044_s23 = sshll.u32 %s1316_s22, 4  ;;  %s1045_s23 = int_to_ptr.vmem [resolvable:$false] %s1044_s23 }
  0x28   : > { %s313_s8 = scalar_lea.hbm %s1685_s1, %s1440_s19  ;;  %p1042_p5 = pnand %p1040_p4, %p1461_p3 }
  0x29   : > { %s1046_s1 = scalar_lea.vmem %s1045_s23, 256  ;;  %p1047_p7 = scmp.lt.s32.totalorder %s316_s12, %s1045_s23 }
  0x2a   : > { %p1043_p6 = pneg %p1042_p5  ;;  %p1048_p10 = scmp.lt.s32.totalorder %s1046_s1, %s1039_s9 }
  0x2c   : > { %p1049_p13 = por %p1048_p10, %p1047_p7 }
  0x2e   : > { %p1050_p12 = pnand %p1049_p13, %p1043_p6 }
  0x30   : > { %1053 = shalt.err (!%p1050_p12)
}
  0x31   : > { %950 = dma.hbm_to_vmem [thread:$0]  (!%p1444_p0), %s313_s8, 128, %s316_s12, %s1664_s17  }
  0x32   : > { %p1475_p4 = pnand %p902_p1, %p415_p2  ;;  %s1688_s3 = sld [smem:[#allocation31_spill]] }
  0x33   : > { %s345_s23 = scalar_lea.vmem [#allocation12], %s1437_s18  ;;  %s1668_s15 = scalar_lea.sflag [#allocation13], %s1449_s21 }
  0x34   : > { %s353_s28 = sshll.u32 %s345_s23, 4  ;;  %s1317_s8 = smov [#allocation12]   ;;  %s354_s28 = int_to_ptr.vmem [resolvable:$true] %s353_s28 }
  0x35   : > { %s1067_s16 = scalar_lea.vmem %s354_s28, 128  ;;  %s1072_s12 = sshll.u32 %s1317_s8, 4  ;;  %s1073_s12 = int_to_ptr.vmem [resolvable:$false] %s1072_s12 }
  0x36   : > { %p1068_p12 = scmp.ne.s32.totalorder %s354_s28, %s1067_s16  ;;  %s1074_s17 = scalar_lea.vmem %s1073_s12, 256 }
  0x37   : > { %p1075_p1 = scmp.lt.s32.totalorder %s354_s28, %s1073_s12  ;;  %p1076_p2 = scmp.lt.s32.totalorder %s1074_s17, %s1067_s16 }
  0x38   : > { %s351_s22 = scalar_lea.hbm %s1688_s3, %s1440_s19  ;;  %p1070_p5 = pnand %p1068_p12, %p1461_p3 }
  0x39   : > { %p1077_p7 = por %p1076_p2, %p1075_p1 }
  0x3a   : > { %p1071_p6 = pneg %p1070_p5 }
  0x3c   : > { %p1078_p10 = pnand %p1077_p7, %p1071_p6 }
  0x3e   : > { %1081 = shalt.err (!%p1078_p10)
}
  0x3f   : > { %956 = dma.hbm_to_vmem [thread:$0]  (!%p1444_p0), %s351_s22, 128, %s354_s28, %s1668_s15  }
  0x40   : > { %s1689_s5 = sld [smem:[#allocation32_spill]]  ;;  %s383_s8 = scalar_lea.vmem [#allocation15], %s1437_s18 }
  0x41   : > { %s391_s3 = sshll.u32 %s383_s8, 4  ;;  %s380_s16 = scalar_lea.sflag [#allocation16], %s1449_s21  ;;  %s392_s3 = int_to_ptr.vmem [resolvable:$true] %s391_s3 }
  0x42   : > { %s1095_s17 = scalar_lea.vmem %s392_s3, 128  ;;  %s1318_s12 = smov [#allocation15]  }
  0x43   : > { %p1096_p13 = scmp.ne.s32.totalorder %s392_s3, %s1095_s17  ;;  %s1100_s29 = sshll.u32 %s1318_s12, 4  ;;  %s1101_s29 = int_to_ptr.vmem [resolvable:$false] %s1100_s29 }
  0x44   : > { %s1102_s24 = scalar_lea.vmem %s1101_s29, 256  ;;  %p1103_p6 = scmp.lt.s32.totalorder %s392_s3, %s1101_s29 }
  0x45   : > { %p1098_p12 = pnand %p1096_p13, %p1461_p3  ;;  %p1104_p1 = scmp.lt.s32.totalorder %s1102_s24, %s1095_s17 }
  0x46   : > { %s389_s23 = scalar_lea.hbm %s1689_s5, %s1440_s19 }
  0x47   : > { %p1099_p5 = pneg %p1098_p12  ;;  %p1105_p2 = por %p1104_p1, %p1103_p6 }
  0x49   : > { %p1106_p7 = pnand %p1105_p2, %p1099_p5 }
  0x4b   : > { %1109 = shalt.err (!%p1106_p7)
}
  0x4c   : > { %962 = dma.hbm_to_vmem [thread:$0]  (!%p1444_p0), %s389_s23, 128, %s392_s3, %s380_s16  }
  0x4d   : > { %s294_s1 = scalar_lea.hbm %s1652_s0, %s1440_s19  ;;  %s288_s9 = scalar_lea.vmem [#allocation6], %s1437_s18 }
  0x4e   : > { %s296_s29 = sshll.u32 %s288_s9, 4  ;;  %s332_s17 = scalar_lea.hbm %s1654_s2, %s1440_s19  ;;  %s297_s29 = int_to_ptr.vmem [resolvable:$true] %s296_s29 }
  0x4f   : > { %s1690_s12 = sand.u32 1, %s1302_s26   ;;  %s1123_s5 = scalar_lea.vmem %s297_s29, 128 }
  0x50   : > { %s285_s15 = scalar_lea.sflag [#allocation7], %s1690_s12  ;;  %p1124_p10 = scmp.ne.s32.totalorder %s297_s29, %s1123_s5 }
  0x51   : > { %s1319_s7 = smov [#allocation6]  }
  0x52   : > { %p1126_p13 = pnand %p1124_p10, %p1461_p3  ;;  %s1128_s3 = sshll.u32 %s1319_s7, 4  ;;  %s1129_s3 = int_to_ptr.vmem [resolvable:$false] %s1128_s3 }
  0x53   : > { %s1130_s23 = scalar_lea.vmem %s1129_s3, 256  ;;  %p1131_p5 = scmp.lt.s32.totalorder %s297_s29, %s1129_s3 }
  0x54   : > { %p1127_p12 = pneg %p1126_p13  ;;  %p1132_p6 = scmp.lt.s32.totalorder %s1130_s23, %s1123_s5 }
  0x56   : > { %p1133_p1 = por %p1132_p6, %p1131_p5 }
  0x58   : > { %p1134_p2 = pnand %p1133_p1, %p1127_p12 }
  0x5a   : > { %1137 = shalt.err (!%p1134_p2)
}
  0x5b   : > { %947 = dma.hbm_to_vmem [thread:$0]  (!%p1444_p0), %s294_s1, 128, %s297_s29, %s285_s15  }
  0x5c   : > { %s326_s28 = scalar_lea.vmem [#allocation11], %s1437_s18  ;;  %s370_s7 = scalar_lea.hbm %s1656_s4, %s1440_s19 }
  0x5d   : > { %s334_s22 = sshll.u32 %s326_s28, 4  ;;  %s1320_s5 = smov [#allocation11]   ;;  %s335_s22 = int_to_ptr.vmem [resolvable:$true] %s334_s22 }
  0x5e   : > { %s1151_s8 = scalar_lea.vmem %s335_s22, 128  ;;  %s1156_s12 = sshll.u32 %s1320_s5, 4  ;;  %s1157_s12 = int_to_ptr.vmem [resolvable:$false] %s1156_s12 }
  0x5f   : > { %p1152_p7 = scmp.ne.s32.totalorder %s335_s22, %s1151_s8  ;;  %s1158_s3 = scalar_lea.vmem %s1157_s12, 256 }
  0x60   : > { %p1159_p12 = scmp.lt.s32.totalorder %s335_s22, %s1157_s12  ;;  %p1160_p5 = scmp.lt.s32.totalorder %s1158_s3, %s1151_s8 }
  0x61   : > { %p1154_p10 = pnand %p1152_p7, %p1461_p3 }
  0x62   : > { %p1161_p6 = por %p1160_p5, %p1159_p12 }
  0x63   : > { %p1155_p13 = pneg %p1154_p10 }
  0x65   : > { %p1162_p1 = pnand %p1161_p6, %p1155_p13 }
  0x67   : > { %1165 = shalt.err (!%p1162_p1)
}
  0x68   : > { %s1691_s15 = scalar_lea.sflag [#allocation10], %s1449_s21  ;;  %s364_s23 = scalar_lea.vmem [#allocation14], %s1437_s18 }
  0x69   : > { %953 = dma.hbm_to_vmem [thread:$0]  (!%p1444_p0), %s332_s17, 128, %s335_s22, %s1691_s15  }
  0x6a   : > { %s372_s28 = sshll.u32 %s364_s23, 4  ;;  %s408_s8 = scalar_lea.hbm %s1658_s6, %s1440_s19  ;;  %s373_s28 = int_to_ptr.vmem [resolvable:$true] %s372_s28 }
  0x6b   : > { %s1179_s5 = scalar_lea.vmem %s373_s28, 128  ;;  %s1321_s12 = smov [#allocation14]  }
  0x6c   : > { %p1180_p2 = scmp.ne.s32.totalorder %s373_s28, %s1179_s5  ;;  %s1184_s3 = sshll.u32 %s1321_s12, 4  ;;  %s1185_s3 = int_to_ptr.vmem [resolvable:$false] %s1184_s3 }
  0x6d   : > { %s1186_s1 = scalar_lea.vmem %s1185_s3, 256  ;;  %p1187_p13 = scmp.lt.s32.totalorder %s373_s28, %s1185_s3 }
  0x6e   : > { %p1182_p7 = pnand %p1180_p2, %p1461_p3  ;;  %p1188_p12 = scmp.lt.s32.totalorder %s1186_s1, %s1179_s5 }
  0x70   : > { %p1183_p10 = pneg %p1182_p7  ;;  %p1189_p5 = por %p1188_p12, %p1187_p13 }
  0x72   : > { %p1190_p6 = pnand %p1189_p5, %p1183_p10 }
  0x74   : > { %1193 = shalt.err (!%p1190_p6)
}
  0x75   : > { %s1692_s17 = scalar_lea.sflag [#allocation13], %s1449_s21  ;;  %s402_s29 = scalar_lea.vmem [#allocation17], %s1437_s18 }
  0x76   : > { %959 = dma.hbm_to_vmem [thread:$0]  (!%p1444_p0), %s370_s7, 128, %s373_s28, %s1692_s17  }
  0x77   : > { %s410_s23 = sshll.u32 %s402_s29, 4  ;;  %s1322_s24 = smov [#allocation17]   ;;  %s411_s23 = int_to_ptr.vmem [resolvable:$true] %s410_s23 }
  0x78   : > { %s1207_s9 = scalar_lea.vmem %s411_s23, 128  ;;  %s1212_s5 = sshll.u32 %s1322_s24, 4  ;;  %s1213_s5 = int_to_ptr.vmem [resolvable:$false] %s1212_s5 }
  0x79   : > { %p1208_p1 = scmp.ne.s32.totalorder %s411_s23, %s1207_s9  ;;  %s1214_s12 = scalar_lea.vmem %s1213_s5, 256 }
  0x7a   : > { %p1215_p10 = scmp.lt.s32.totalorder %s411_s23, %s1213_s5  ;;  %p1216_p13 = scmp.lt.s32.totalorder %s1214_s12, %s1207_s9 }
  0x7b   : > { %p1210_p2 = pnand %p1208_p1, %p1461_p3 }
  0x7c   : > { %p1217_p12 = por %p1216_p13, %p1215_p10 }
  0x7d   : > { %p1211_p7 = pneg %p1210_p2 }
  0x7f   : > { %p1218_p5 = pnand %p1217_p12, %p1211_p7 }
  0x81   : > { %1221 = shalt.err (!%p1218_p5)
}
  0x82   : > { %965 = dma.hbm_to_vmem [thread:$0]  (!%p1444_p0), %s408_s8, 128, %s411_s23, %s380_s16  }
  0x83   : > { %419 = sbr.rel (%p1475_p4) target bundleno = 397 (0x18d), region = 48  ;;  %s1565_s11 = sand.u32 (!%p1475_p4), 1, %s1298_s25  }
  0x84   : > { %s1568_s28 = sshll.u32 (!%p1475_p4), %s1565_s11, 3  ;;  %s422_s20 = scalar_lea.sflag (!%p1475_p4), [#allocation7], %s1565_s11 }
  0x85   : > { %s425_s21 = scalar_lea.vmem (!%p1475_p4), [#allocation6], %s1568_s28 }
  0x88   : > { %1273 = dma.done.wait (%p1417_p8), %s422_s20, 128  }
  0x89   : > { %1275 = vsyncadd (%p1417_p8), %s422_s20, 4294967168  ;;  %s430_s19 = sand.u32 1, %s1397_s30   ;;  %s434_s16 = scalar_lea.vmem [#allocation9], %s1568_s28 }
  0x8a   : > { %s431_s10 = scalar_lea.sflag [#allocation10], %s430_s19 }
  0x8b   : > { %1277 = dma.done.wait (%p1417_p8), %s431_s10, 256  }
  0x8c   : > { %1279 = vsyncadd (%p1417_p8), %s431_s10, 4294967040  ;;  %s443_s8 = scalar_lea.vmem [#allocation11], %s1568_s28  ;;  %s449_s3 = scalar_lea.sflag [#allocation13], %s430_s19 }
  0x8d   : > { %s452_s1 = scalar_lea.vmem [#allocation12], %s1568_s28 }
  0x8e   : > { %1281 = dma.done.wait (%p1417_p8), %s449_s3, 256  }
  0x8f   : > { %1283 = vsyncadd (%p1417_p8), %s449_s3, 4294967040  ;;  %s461_s30 = scalar_lea.vmem [#allocation14], %s1568_s28  ;;  %s467_s17 = scalar_lea.sflag [#allocation16], %s430_s19 }
  0x90   : > { %s470_s22 = scalar_lea.vmem [#allocation15], %s1568_s28 }
  0x91   : > { %1285 = dma.done.wait (%p1417_p8), %s467_s17, 256  }
  0x92   : > { %1287 = vsyncadd (%p1417_p8), %s467_s17, 4294967040  ;;  %v589_v0 = vld [vmem:[%s443_s8] sm:$0xff]  ;;  %v590_v1 = vld [vmem:[%s470_s22] sm:$0xff]  ;;  %s479_s15 = scalar_lea.vmem [#allocation17], %s1568_s28  ;;  %s910_s13 = sshll.u32 %s1565_s11, 5 }
  0x93   : > { %v591_v2 = vsub.f32 %v589_v0, %v590_v1  ;;  %v555_v3 = vld [vmem:[%s425_s21] sm:$0xff]  ;;  %v556_v10 = vld [vmem:[%s452_s1] sm:$0xff]  ;;  %s539_s23 = scalar_lea.vmem [#allocation18], %s910_s13  ;;  %s919_s24 = sshll.u32 %s1306_s27, 9 }
  0x94   : > { %v557_v4 = vld [vmem:[%s479_s15] sm:$0xff]  ;;  %v558_v5 = vsub.f32 1.0, %v555_v3  ;;  %v562_v6 = vadd.f32 1e-07, %v555_v3  ;;  %v559_v11 = vsub.f32 1.0, %v556_v10  ;;  %v571_v16 = vmul.f32 %v555_v3, %v555_v3  ;;  %v581_v18 = vld [vmem:[%s434_s16] sm:$0xff] }
  0x95   : > { %v592_v7 = vand.u32 2147483647, %v591_v2  ;;  %v582_v19 = vld [vmem:[%s461_s30] sm:$0xff]  ;;  %v574_v24 = vsub.f32 1.0, %v557_v4  ;;  %s667_s9 = sshll.u32 %s539_s23, 4  ;;  %s1693_s7 = sld [smem:[#allocation33_spill]]  ;;  %s1599_s9 = int_to_ptr.vmem [resolvable:$true] %s667_s9 }
  0x96   : > { %1022 = vlog2.f32 %v562_v6  ;;  %v568_v8 = vadd.f32 1e-07, %v558_v5  ;;  %v560_v12 = vmul.f32 %v559_v11, %v559_v11  ;;  %v565_v13 = vmul.f32 %v558_v5, %v558_v5  ;;  %s654_s27 = scalar_lea.sflag [#allocation8], %s1565_s11  ;;  %s1222_s19 = scalar_lea.vmem %s1599_s9, 512 }
  0x97   : > { %v593_v9 = vmul.f32 %v592_v7, %v557_v4  ;;  %v583_v25 = vsub.f32 %v581_v18, %v582_v19  ;;  %p1223_p8 = scmp.ne.s32.totalorder %s1599_s9, %s1222_s19  ;;  %s1323_s10 = smov [#allocation18]  }
  0x98   : > { %1024 = vlog2.f32 %v568_v8  ;;  %v561_v20 = vmul.f32 %v560_v12, %v560_v12  ;;  %s1226_s16 = sshll.u32 %s1323_s10, 4  ;;  %s1227_s16 = int_to_ptr.vmem [resolvable:$false] %s1226_s16 }
  0x99   : > { %628 = vadd.xlane.f32.xlu1 %v593_v9  ;;  %v584_v29 = vand.u32 2147483647, %v583_v25  ;;  %p1224_p0 = pnand %p1223_p8, %p1421_p9  ;;  %s1228_s8 = scalar_lea.vmem %s1227_s16, 1024 }
  0x9a   : > { %p1229_p4 = scmp.lt.s32.totalorder %s1599_s9, %s1227_s16  ;;  %p1230_p6 = scmp.lt.s32.totalorder %s1228_s8, %s1222_s19 }
  0x9b   : > { %v585_v31 = vmul.f32 %v584_v29, %v557_v4  ;;  %s1604_s28 = scalar_lea.hbm %s1693_s7, %s919_s24  ;;  %p1225_p3 = pneg %p1224_p0 }
  0x9c   : > { %p1231_p1 = por %p1230_p6, %p1229_p4 }
  0x9d   : > { %641 = vadd.xlane.f32.xlu1 %v557_v4 }
  0x9e   : > { %p1232_p2 = pnand %p1231_p1, %p1225_p3 }
  0xa3   : > { %v1023_v14 = vpop.eup %1022 }
  0xa4   : > { %v564_v15 = vmul.f32 0.6931472, %v1023_v14 }
  0xa5   : > { %v1025_v17 = vpop.eup %1024 }
  0xa6   : > { %v566_v21 = vmul.f32 %v565_v13, %v564_v15  ;;  %v570_v22 = vmul.f32 0.6931472, %v1025_v17 }
  0xa8   : > { %v572_v23 = vmul.f32 %v571_v16, %v570_v22  ;;  %v567_v26 = vmul.f32 %v566_v21, %v557_v4 }
  0xaa   : > { %v573_v27 = vmul.f32 %v572_v23, %v561_v20 }
  0xac   : > { %v575_v28 = vmul.f32 %v574_v24, %v573_v27 }
  0xae   : > { %v577_v30 = vadd.f32 %v575_v28, %v567_v26 }
  0xb0   : > { %603 = vadd.xlane.f32.xlu0 %v577_v30 }
  0xb4   : > { %615 = vadd.xlane.f32.xlu0 %v585_v31 }
 0x122   : > { %v629_v32 = vpop.xlane.xlu1 %628 }
 0x123   : > { %v630_v34 = vrot.slane %v629_v32, 4 }
 0x125   : > { %v631_v36 = vadd.f32 %v630_v34, %v629_v32 }
 0x126   : > { %v642_v33 = vpop.xlane.xlu1 %641 }
 0x127   : > { %v643_v35 = vrot.slane %v642_v33, 4  ;;  %v632_v41 = vrot.slane %v631_v36, 2 }
 0x129   : > { %v644_v38 = vadd.f32 %v643_v35, %v642_v33  ;;  %v633_v48 = vadd.f32 %v632_v41, %v631_v36 }
 0x12b   : > { %v645_v43 = vrot.slane %v644_v38, 2  ;;  %v634_v54 = vrot.slane %v633_v48, 1 }
 0x12d   : > { %v646_v49 = vadd.f32 %v645_v43, %v644_v38  ;;  %v635_v58 = vadd.f32 %v634_v54, %v633_v48 }
 0x12f   : > { %v647_v56 = vrot.slane %v646_v49, 1 }
 0x131   : > { %v648_v59 = vadd.f32 %v647_v56, %v646_v49 }
 0x139   : > { %v604_v37 = vpop.xlane.xlu0 %603 }
 0x13a   : > { %v605_v39 = vrot.slane %v604_v37, 4 }
 0x13c   : > { %v606_v40 = vadd.f32 %v605_v39, %v604_v37 }
 0x13d   : > { %v616_v42 = vpop.xlane.xlu0 %615 }
 0x13e   : > { %v607_v44 = vrot.slane %v606_v40, 2  ;;  %v617_v45 = vrot.slane %v616_v42, 4 }
 0x140   : > { %v618_v46 = vadd.f32 %v617_v45, %v616_v42  ;;  %v608_v47 = vadd.f32 %v607_v44, %v606_v40 }
 0x142   : > { %v619_v50 = vrot.slane %v618_v46, 2  ;;  %v609_v51 = vrot.slane %v608_v47, 1 }
 0x144   : > { %v620_v52 = vadd.f32 %v619_v50, %v618_v46  ;;  %v610_v53 = vadd.f32 %v609_v51, %v608_v47 }
 0x146   : > { %920 = vpush %v610_v53  ;;  %v621_v55 = vrot.slane %v620_v52, 1 }
 0x148   : > { %v622_v57 = vadd.f32 %v621_v55, %v620_v52 }
 0x14a   : > { %922 = vpush %v622_v57 }
 0x14b   : > { %924 = vpush %v635_v58 }
 0x14c   : > { %926 = vpush %v648_v59 }
 0x177   : > { %s921_s29 = spop %920 }
 0x178   : > { %v612_v60 = vstv %s921_s29 }
 0x179   : > { %613 = vst [vmem:[%s539_s23] sm:$0xff] %v612_v60 }
 0x17b   : > { %s923_s5 = spop %922 }
 0x17c   : > { %v624_v61 = vstv %s923_s5  ;;  %s925_s20 = spop %924 }
 0x17d   : > { %911 = vst [vmem:[%s539_s23 + $0x8] sm:$0xff] %v624_v61  ;;  %v637_v62 = vstv %s925_s20  ;;  %s927_s21 = spop %926 }
 0x17e   : > { %912 = vst [vmem:[%s539_s23 + $0x10] sm:$0xff] %v637_v62  ;;  %v650_v63 = vstv %s927_s21 }
 0x17f   : > { %913 = vst [vmem:[%s539_s23 + $0x18] sm:$0xff] %v650_v63 }
 0x180   : > { %1235 = shalt.err (!%p1232_p2)
}
 0x181   : > { %s1236_s3 = scalar_lea.hbm %s1604_s28, 512  ;;  %s1240_s17 = scalar_lea.hbm %s1693_s7, 1024 }
 0x182   : > { %p1237_p7 = scmp.ne.s32.totalorder %s1604_s28, %s1236_s3  ;;  %p1241_p12 = scmp.lt.s32.totalorder %s1604_s28, %s1693_s7 }
 0x183   : > { %p1242_p5 = scmp.lt.s32.totalorder %s1240_s17, %s1236_s3 }
 0x184   : > { %p1238_p10 = pnand %p1237_p7, %p1421_p9 }
 0x185   : > { %p1243_p8 = por %p1242_p5, %p1241_p12 }
 0x186   : > { %p1239_p13 = pneg %p1238_p10 }
 0x188   : > { %p1244_p0 = pnand %p1243_p8, %p1239_p13 }
 0x18a   : > { %1247 = shalt.err (!%p1244_p0)
}
 0x18b   : > { %s1324_s13 = smov 128   ;;  %s1325_s29 = smov 8  }
 0x18c   : > { %942 = dma.vmem_to_hbm [thread:$0]  (%p1421_p9), %s1599_s9, 512, %s1604_s28, %s654_s27, %s1324_s13, %s1324_s13, %s1325_s29  }
 0x18d PF: > { %s1694_s23 = sld [smem:[#allocation24_spill]] }
 0x18e   : > { %s1696_s5 = sld [smem:[#allocation26_spill]] }
 0x193   : > { %s682_s12 = sand.u32 1, %s1694_s23  }
 0x194   : > { %p1697_p3 = scmp.ge.s32.totalorder %s1696_s5, 2  ;;  %s683_s18 = scalar_lea.sflag [#allocation8], %s682_s12 }
 0x196   : > { %p967_p4 = pnand %p1697_p3, %p1428_p11 }
 0x198   : > { %p968_p6 = pneg %p967_p4 }
 0x19a   : > { %1289 = dma.done.wait (%p968_p6), %s683_s18, 512  }
 0x19b   : > { %1291 = vsyncadd (%p968_p6), %s683_s18, 4294966784  ;;  %s32_s29 = sadd.s32 1, %s1696_s5   ;;  %s1698_s14 = sld [smem:[#allocation28_spill]] }
 0x19c   : > { %p29_p1 = scmp.ge.s32.totalorder %s32_s29, 4   ;;  %s1699_s27 = sld [smem:[#allocation25_spill]] }
 0x19d   : > { %s1700_s28 = sld [smem:[#allocation27_spill]]  ;;  %s1701_s24 = smov %s1298_s25 }
 0x19e   : > { %s1702_s25 = smov %s1302_s26  ;;  %31 = sbr.rel (!%p29_p1) target bundleno = 17 (0x11), region = 176 }
 0x1a1   : > { %s1703_s26 = smov %s1698_s14 }
 0x1a3   :  { %688 = vsyncpa [#allocation7], 1 }
 0x1a4   :  { %690 = vsyncpa [#allocation7 + $0x1], 1 }
 0x1a5   :  { %691 = vsyncpa [#allocation10], 1 }
 0x1a6   :  { %693 = vsyncpa [#allocation10 + $0x1], 1 }
 0x1a7   :  { %694 = vsyncpa [#allocation13], 1 }
 0x1a8   :  { %696 = vsyncpa [#allocation13 + $0x1], 1 }
 0x1a9   :  { %697 = vsyncpa [#allocation16], 1 }
 0x1aa   :  { %699 = vsyncpa [#allocation16 + $0x1], 1 }
 0x1ab   :  { %700 = vsyncpa [#allocation8], 1 }
 0x1ac   :  { %702 = vsyncpa [#allocation8 + $0x1], 1 }

</bundles_post_ra>
